<compile_context>
chip_gen: v6e
topology: v6e:2x2x1
jax: 0.10.0
libtpu: 0.0.40
codegen_flags: <defaults>
</compile_context>

<pallas_src>
import functools

import jax
import jax.numpy as jnp
from jax.experimental import pallas as pl
from jax.experimental.pallas import tpu as pltpu


# ----------------------------------------------------------------------------
# helpers
# ----------------------------------------------------------------------------
def _pick_hw_tile(hw, max_elems):
    """Largest lane-aligned (multiple-of-128) divisor of hw <= max_elems.

    Falls back to the full dimension (always a legal block shape)."""
    if hw <= max_elems:
        return hw
    t = (max_elems // 128) * 128
    while t >= 128:
        if hw % t == 0:
            return t
        t -= 128
    return hw


# ----------------------------------------------------------------------------
# 1) fused 1x1 conv + BatchNorm (inference) + ReLU
# ----------------------------------------------------------------------------
def _conv1x1_bn_act_kernel(x_ref, w_ref, scale_ref, shift_ref, o_ref, *, relu):
    # x_ref: (1, C_in, hw_tile)   w_ref: (C_out, C_in)
    # scale/shift: (C_out, 1)     o_ref: (1, C_out, hw_tile)
    y = jnp.dot(w_ref[...], x_ref[0], preferred_element_type=jnp.float32)
    y = y * scale_ref[...] + shift_ref[...]
    if relu:
        y = jnp.maximum(y, 0.0)
    o_ref[0] = y.astype(o_ref.dtype)


def conv1x1_bn_relu(x, weight, gamma, beta, running_mean, running_var,
                    *, eps=1e-5, relu=True):
    """NCHW 1x1 conv (no bias) + folded BN + optional ReLU."""
    B, C_in, H, W = x.shape
    C_out = weight.shape[0]
    hw = H * W

    # Fold BN into a per-channel scale/shift (inference semantics).
    scale = gamma.astype(jnp.float32) * jax.lax.rsqrt(
        running_var.astype(jnp.float32) + eps)
    shift = beta.astype(jnp.float32) - running_mean.astype(jnp.float32) * scale

    xr = x.reshape(B, C_in, hw)

    # Size the spatial tile against a conservative VMEM budget
    # (input + output double-buffered, weight resident).
    itemsize = jnp.dtype(x.dtype).itemsize
    budget = 8 * 1024 * 1024
    w_bytes = 2 * C_out * C_in * itemsize
    per_col = (C_in + C_out) * itemsize * 2
    hw_tile = _pick_hw_tile(hw, max(128, (budget - w_bytes) // max(1, per_col)))
    grid = (B, hw // hw_tile)

    out = pl.pallas_call(
        functools.partial(_conv1x1_bn_act_kernel, relu=relu),
        out_shape=jax.ShapeDtypeStruct((B, C_out, hw), x.dtype),
        grid_spec=pltpu.PrefetchScalarGridSpec(
            num_scalar_prefetch=0,
            grid=grid,
            in_specs=[
                pl.BlockSpec((1, C_in, hw_tile), lambda b, s: (b, 0, s)),
                pl.BlockSpec((C_out, C_in), lambda b, s: (0, 0)),
                pl.BlockSpec((C_out, 1), lambda b, s: (0, 0)),
                pl.BlockSpec((C_out, 1), lambda b, s: (0, 0)),
            ],
            out_specs=pl.BlockSpec((1, C_out, hw_tile), lambda b, s: (b, 0, s)),
        ),
        compiler_params=pltpu.CompilerParams(
            dimension_semantics=("parallel", "parallel")),
    )(xr, weight, scale.reshape(C_out, 1), shift.reshape(C_out, 1))
    return out.reshape(B, C_out, H, W)


def conv1x1_bn_relu_ref(x, weight, gamma, beta, running_mean, running_var,
                        *, eps=1e-5, relu=True):
    hi = jax.lax.Precision.HIGHEST
    y = jnp.einsum('oc,bchw->bohw', weight, x, precision=hi)
    scale = gamma / jnp.sqrt(running_var + eps)
    shift = beta - running_mean * scale
    y = y * scale[None, :, None, None] + shift[None, :, None, None]
    return jnp.maximum(y, 0.0) if relu else y


# ----------------------------------------------------------------------------
# 2) fused ChannelAttention (CAB): concat -> GAP -> SE-MLP -> x1*attn + x2
# ----------------------------------------------------------------------------
def _cab_kernel(x1_ref, x2_ref, w1a_ref, w1b_ref, b1_ref, w2_ref, b2_ref,
                o_ref):
    # x1/x2: (1, C, HW); w1a/w1b: (C, hidden); b1: (1, hidden)
    # w2: (C, hidden); b2: (C, 1); o: (1, C, HW)
    x1 = x1_ref[0].astype(jnp.float32)
    x2 = x2_ref[0].astype(jnp.float32)
    m1 = jnp.mean(x1, axis=-1, keepdims=True)        # (C, 1)
    m2 = jnp.mean(x2, axis=-1, keepdims=True)        # (C, 1)
    # SE MLP via broadcast-multiply + reductions (tiny dims; VPU/XLU only).
    h = (jnp.sum(w1a_ref[...] * m1, axis=0, keepdims=True)
         + jnp.sum(w1b_ref[...] * m2, axis=0, keepdims=True)
         + b1_ref[...])                              # (1, hidden)
    h = jnp.maximum(h, 0.0)
    a = jnp.sum(w2_ref[...] * h, axis=1, keepdims=True) + b2_ref[...]  # (C, 1)
    a = 1.0 / (1.0 + jnp.exp(-a))                    # sigmoid
    o_ref[0] = (x1 * a + x2).astype(o_ref.dtype)


def channel_attention(x1, x2, w1, b1, w2, b2):
    """CAB: fm = x1 * SE(concat(x1, x2)) + x2 (torch Linear weight layout)."""
    B, C, H, W = x1.shape
    hidden = w1.shape[0]
    hw = H * W
    f32 = jnp.float32

    # Split the first Linear along its input (channels of x1 vs x2) so the
    # kernel never needs an in-kernel concatenation; pre-transpose so the
    # contraction runs over the sublane axis.
    w1a_t = jnp.transpose(w1[:, :C]).astype(f32)     # (C, hidden)
    w1b_t = jnp.transpose(w1[:, C:]).astype(f32)     # (C, hidden)
    b1_row = b1.reshape(1, hidden).astype(f32)
    w2_f = w2.astype(f32)                            # (C, hidden)
    b2_col = b2.reshape(C, 1).astype(f32)

    out = pl.pallas_call(
        _cab_kernel,
        out_shape=jax.ShapeDtypeStruct((B, C, hw), x1.dtype),
        grid_spec=pltpu.PrefetchScalarGridSpec(
            num_scalar_prefetch=0,
            grid=(B,),
            in_specs=[
                pl.BlockSpec((1, C, hw), lambda b: (b, 0, 0)),
                pl.BlockSpec((1, C, hw), lambda b: (b, 0, 0)),
                pl.BlockSpec((C, hidden), lambda b: (0, 0)),
                pl.BlockSpec((C, hidden), lambda b: (0, 0)),
                pl.BlockSpec((1, hidden), lambda b: (0, 0)),
                pl.BlockSpec((C, hidden), lambda b: (0, 0)),
                pl.BlockSpec((C, 1), lambda b: (0, 0)),
            ],
            out_specs=pl.BlockSpec((1, C, hw), lambda b: (b, 0, 0)),
        ),
        compiler_params=pltpu.CompilerParams(
            dimension_semantics=("parallel",)),
    )(x1.reshape(B, C, hw), x2.reshape(B, C, hw),
      w1a_t, w1b_t, b1_row, w2_f, b2_col)
    return out.reshape(B, C, H, W)


def channel_attention_ref(x1, x2, w1, b1, w2, b2):
    hi = jax.lax.Precision.HIGHEST
    fm = jnp.concatenate([x1, x2], axis=1)
    y = jnp.mean(fm, axis=(2, 3))                                   # (B, 2C)
    y = jnp.maximum(jnp.dot(y, w1.T, precision=hi) + b1, 0.0)
    y = jax.nn.sigmoid(jnp.dot(y, w2.T, precision=hi) + b2)         # (B, C)
    return x1 * y[:, :, None, None] + x2


# ----------------------------------------------------------------------------
# 3) bilinear upsample, align_corners=True (as two interp-matrix matmuls)
# ----------------------------------------------------------------------------
def _bilinear_kernel(x_ref, ah_ref, awt_ref, o_ref):
    x = x_ref[0].astype(jnp.float32)                                 # (H, W)
    t = jnp.dot(ah_ref[...], x, preferred_element_type=jnp.float32)  # (Ho, W)
    y = jnp.dot(t, awt_ref[...], preferred_element_type=jnp.float32) # (Ho, Wo)
    o_ref[0] = y.astype(o_ref.dtype)


def _interp_matrix(n_out, n_in):
    """Row-stochastic (n_out, n_in) bilinear weights, align_corners=True."""
    if n_in == 1:
        return jnp.ones((n_out, 1), jnp.float32)
    pos = jnp.arange(n_out, dtype=jnp.float32) * (n_in - 1) / max(n_out - 1, 1)
    lo = jnp.clip(jnp.floor(pos).astype(jnp.int32), 0, n_in - 2)
    frac = pos - lo.astype(jnp.float32)
    rows = jnp.arange(n_out)
    m = jnp.zeros((n_out, n_in), jnp.float32)
    m = m.at[rows, lo].add(1.0 - frac)
    m = m.at[rows, lo + 1].add(frac)
    return m


def upsample_bilinear_align_corners(x, scale):
    B, C, H, W = x.shape
    Ho, Wo = H * scale, W * scale
    ah = _interp_matrix(Ho, H)                 # (Ho, H)
    awt = jnp.transpose(_interp_matrix(Wo, W)) # (W, Wo)
    xr = x.reshape(B * C, H, W)
    out = pl.pallas_call(
        _bilinear_kernel,
        out_shape=jax.ShapeDtypeStruct((B * C, Ho, Wo), x.dtype),
        grid_spec=pltpu.PrefetchScalarGridSpec(
            num_scalar_prefetch=0,
            grid=(B * C,),
            in_specs=[
                pl.BlockSpec((1, H, W), lambda i: (i, 0, 0)),
                pl.BlockSpec((Ho, H), lambda i: (0, 0)),
                pl.BlockSpec((W, Wo), lambda i: (0, 0)),
            ],
            out_specs=pl.BlockSpec((1, Ho, Wo), lambda i: (i, 0, 0)),
        ),
        compiler_params=pltpu.CompilerParams(
            dimension_semantics=("parallel",)),
    )(xr, ah, awt)
    return out.reshape(B, C, Ho, Wo)


def upsample_bilinear_ref(x, scale):
    B, C, H, W = x.shape
    Ho, Wo = H * scale, W * scale
    sh = jnp.arange(Ho, dtype=jnp.float32) * (H - 1) / max(Ho - 1, 1)
    sw = jnp.arange(Wo, dtype=jnp.float32) * (W - 1) / max(Wo - 1, 1)
    h0 = jnp.clip(jnp.floor(sh).astype(jnp.int32), 0, H - 2)
    w0 = jnp.clip(jnp.floor(sw).astype(jnp.int32), 0, W - 2)
    hf = (sh - h0)[None, None, :, None]
    wf = (sw - w0)[None, None, None, :]
    g = lambda hi, wi: x[:, :, hi, :][:, :, :, wi]
    top = g(h0, w0) * (1.0 - wf) + g(h0, w0 + 1) * wf
    bot = g(h0 + 1, w0) * (1.0 - wf) + g(h0 + 1, w0 + 1) * wf
    return top * (1.0 - hf) + bot * hf


# ----------------------------------------------------------------------------
# 4) log_softmax over the channel dim (final DFN output)
# ----------------------------------------------------------------------------
def _log_softmax_c_kernel(x_ref, o_ref):
    v = x_ref[0].astype(jnp.float32)                     # (C, hw)
    m = jnp.max(v, axis=0, keepdims=True)                # (1, hw)
    s = jnp.sum(jnp.exp(v - m), axis=0, keepdims=True)   # (1, hw)
    o_ref[0] = (v - m - jnp.log(s)).astype(o_ref.dtype)


def log_softmax_channels(x):
    B, C, H, W = x.shape
    hw = H * W
    hw_tile = _pick_hw_tile(hw, 4096)
    out = pl.pallas_call(
        _log_softmax_c_kernel,
        out_shape=jax.ShapeDtypeStruct((B, C, hw), x.dtype),
        grid_spec=pltpu.PrefetchScalarGridSpec(
            num_scalar_prefetch=0,
            grid=(B, hw // hw_tile),
            in_specs=[pl.BlockSpec((1, C, hw_tile), lambda b, s: (b, 0, s))],
            out_specs=pl.BlockSpec((1, C, hw_tile), lambda b, s: (b, 0, s)),
        ),
        compiler_params=pltpu.CompilerParams(
            dimension_semantics=("parallel", "parallel")),
    )(x.reshape(B, C, hw))
    return out.reshape(B, C, H, W)


# ----------------------------------------------------------------------------
# demo / correctness checks
# ----------------------------------------------------------------------------
if __name__ == "__main__":
    key = jax.random.PRNGKey(0)
    ks = jax.random.split(key, 16)

    # 1) fused 1x1 conv + BN + ReLU  (ConvBnRelu / RefineResidual / DFNHead)
    B, C_in, C_out, H, W = 2, 64, 32, 16, 16
    x = jax.random.normal(ks[0], (B, C_in, H, W), jnp.float32)
    w = jax.random.normal(ks[1], (C_out, C_in), jnp.float32) * 0.05
    gamma = 1.0 + 0.1 * jax.random.normal(ks[2], (C_out,), jnp.float32)
    beta = 0.1 * jax.random.normal(ks[3], (C_out,), jnp.float32)
    rmean = 0.1 * jax.random.normal(ks[4], (C_out,), jnp.float32)
    rvar = jax.random.uniform(ks[5], (C_out,), jnp.float32, minval=0.5, maxval=1.5)
    out = jax.block_until_ready(conv1x1_bn_relu(x, w, gamma, beta, rmean, rvar))
    ref = conv1x1_bn_relu_ref(x, w, gamma, beta, rmean, rvar)
    assert out.shape == ref.shape
    assert bool(jnp.allclose(out, ref, atol=2e-2, rtol=2e-2)), "conv1x1_bn_relu mismatch"

    # 2) fused ChannelAttention (CAB), reduction = 1 as in DFN
    C = 32
    x1 = jax.random.normal(ks[6], (B, C, H, W), jnp.float32)
    x2 = jax.random.normal(ks[7], (B, C, H, W), jnp.float32)
    hidden = C
    w1 = jax.random.normal(ks[8], (hidden, 2 * C), jnp.float32) * 0.05
    b1 = jax.random.normal(ks[9], (hidden,), jnp.float32) * 0.05
    w2 = jax.random.normal(ks[10], (C, hidden), jnp.float32) * 0.05
    b2 = jax.random.normal(ks[11], (C,), jnp.float32) * 0.05
    out = jax.block_until_ready(channel_attention(x1, x2, w1, b1, w2, b2))
    ref = channel_attention_ref(x1, x2, w1, b1, w2, b2)
    assert bool(jnp.allclose(out, ref, atol=1e-3, rtol=1e-3)), "channel_attention mismatch"

    # 3) bilinear upsample with align_corners=True (DFN uses it everywhere)
    xb = jax.random.normal(ks[12], (2, 8, 8, 8), jnp.float32)
    out = jax.block_until_ready(upsample_bilinear_align_corners(xb, 2))
    ref = upsample_bilinear_ref(xb, 2)
    assert out.shape == (2, 8, 16, 16)
    assert bool(jnp.allclose(out, ref, atol=2e-2, rtol=2e-2)), "bilinear upsample mismatch"

    # 4) final log_softmax over channels
    xl = jax.random.normal(ks[13], (2, 8, 16, 16), jnp.float32)
    out = jax.block_until_ready(log_softmax_channels(xl))
    ref = jax.nn.log_softmax(xl, axis=1)
    assert bool(jnp.allclose(out, ref, atol=1e-4, rtol=1e-4)), "log_softmax mismatch"

    print("KERNEL_OK")
</pallas_src>

<mosaic_0001>
module attributes {stable_mosaic.version = 11 : i64} {
  func.func @_conv1x1_bn_act_kernel(%arg0: i32, %arg1: i32, %arg2: memref<1x64x256xf32, #tpu.memory_space<vmem>>, %arg3: memref<32x64xf32, #tpu.memory_space<vmem>>, %arg4: memref<32x1xf32, #tpu.memory_space<vmem>>, %arg5: memref<32x1xf32, #tpu.memory_space<vmem>>, %arg6: memref<1x32x256xf32, #tpu.memory_space<vmem>>) attributes {dimension_semantics = [#tpu.dimension_semantics<parallel>, #tpu.dimension_semantics<parallel>], iteration_bounds = array<i64: 2, 1>, scalar_prefetch = 0 : i64, scratch_operands = 0 : i64, tpu.core_type = #tpu.core_type<tc>, window_params = [{transform_indices = @transform_0, window_bounds = array<i64: 1, 64, 256>}, {pipeline_mode = #tpu.pipeline_mode<synchronous>, transform_indices = @transform_1, window_bounds = array<i64: 32, 64>}, {pipeline_mode = #tpu.pipeline_mode<synchronous>, transform_indices = @transform_2, window_bounds = array<i64: 32, 1>}, {pipeline_mode = #tpu.pipeline_mode<synchronous>, transform_indices = @transform_3, window_bounds = array<i64: 32, 1>}, {transform_indices = @transform_4, window_bounds = array<i64: 1, 32, 256>}]} {
    %c0 = arith.constant 0 : index
    %c0_0 = arith.constant 0 : index
    %0 = vector.load %arg3[%c0, %c0_0] : memref<32x64xf32, #tpu.memory_space<vmem>>, vector<32x64xf32>
    %c0_1 = arith.constant 0 : index
    %c0_2 = arith.constant 0 : index
    %c0_3 = arith.constant 0 : index
    %1 = vector.load %arg2[%c0_1, %c0_2, %c0_3] : memref<1x64x256xf32, #tpu.memory_space<vmem>>, vector<1x64x256xf32>
    %2 = vector.shape_cast %1 : vector<1x64x256xf32> to vector<64x256xf32>
    %cst = arith.constant dense<0.000000e+00> : vector<32x256xf32>
    %3 = tpu.matmul %0, %2, %cst {dimension_numbers = #tpu.dot_dimension_numbers<[1], [0], [0], [1], [0, 0, 1, 1], [], []>} : vector<32x64xf32>, vector<64x256xf32>, vector<32x256xf32> -> vector<32x256xf32>
    %c0_4 = arith.constant 0 : index
    %c0_5 = arith.constant 0 : index
    %4 = vector.load %arg4[%c0_4, %c0_5] : memref<32x1xf32, #tpu.memory_space<vmem>>, vector<32x1xf32>
    %5 = vector.broadcast %4 : vector<32x1xf32> to vector<32x256xf32>
    %6 = arith.mulf %3, %5 : vector<32x256xf32>
    %c0_6 = arith.constant 0 : index
    %c0_7 = arith.constant 0 : index
    %7 = vector.load %arg5[%c0_6, %c0_7] : memref<32x1xf32, #tpu.memory_space<vmem>>, vector<32x1xf32>
    %8 = vector.broadcast %7 : vector<32x1xf32> to vector<32x256xf32>
    %9 = arith.addf %6, %8 : vector<32x256xf32>
    %cst_8 = arith.constant 0.000000e+00 : f32
    %10 = vector.broadcast %cst_8 : f32 to vector<32x256xf32>
    %11 = arith.maximumf %9, %10 : vector<32x256xf32>
    %c0_9 = arith.constant 0 : index
    %c0_10 = arith.constant 0 : index
    %c0_11 = arith.constant 0 : index
    %12 = vector.load %arg6[%c0_9, %c0_10, %c0_11] : memref<1x32x256xf32, #tpu.memory_space<vmem>>, vector<1x32x256xf32>
    %13 = vector.shape_cast %12 : vector<1x32x256xf32> to vector<32x256xf32>
    %14 = vector.shape_cast %11 : vector<32x256xf32> to vector<1x32x256xf32>
    tpu.vector_store %arg6[%c0_9, %c0_10, %c0_11], %14 {strides = array<i32>} : memref<1x32x256xf32, #tpu.memory_space<vmem>>, vector<1x32x256xf32>,
    return
  }
  func.func @transform_0(%arg0: i32, %arg1: i32) -> (i32, i32, i32) {
    %c0_i32 = arith.constant 0 : i32
    %c0_i32_0 = arith.constant 0 : i32
    return %arg0, %c0_i32, %arg1 : i32, i32, i32
  }
  func.func @transform_1(%arg0: i32, %arg1: i32) -> (i32, i32) {
    %c0_i32 = arith.constant 0 : i32
    %c0_i32_0 = arith.constant 0 : i32
    %c0_i32_1 = arith.constant 0 : i32
    return %c0_i32, %c0_i32_0 : i32, i32
  }
  func.func @transform_2(%arg0: i32, %arg1: i32) -> (i32, i32) {
    %c0_i32 = arith.constant 0 : i32
    %c0_i32_0 = arith.constant 0 : i32
    %c0_i32_1 = arith.constant 0 : i32
    return %c0_i32, %c0_i32_0 : i32, i32
  }
  func.func @transform_3(%arg0: i32, %arg1: i32) -> (i32, i32) {
    %c0_i32 = arith.constant 0 : i32
    %c0_i32_0 = arith.constant 0 : i32
    %c0_i32_1 = arith.constant 0 : i32
    return %c0_i32, %c0_i32_0 : i32, i32
  }
  func.func @transform_4(%arg0: i32, %arg1: i32) -> (i32, i32, i32) {
    %c0_i32 = arith.constant 0 : i32
    %c0_i32_0 = arith.constant 0 : i32
    return %arg0, %c0_i32, %arg1 : i32, i32, i32
  }
}

</mosaic_0001>

<bundles_post_ra>
// kernel: tpu_custom_call.1
= control target key start
LH: loop header
LB: loop body
LE: loop exit
PB: predicated region body
PF: predicated region fallthrough
CT: control target
= control target key end

     0   :  { %9 = vsyncpa [#allocation3], 0  ;;  %s996_s0 = inlined_call_operand.hbm [shape: f32[2,64,256], index: 0, kind: input, shape index: {}]   ;;  %s997_s1 = inlined_call_operand.vmem [shape: f32[32,64], index: 1, kind: input, shape index: {}]   ;;  %s998_s2 = inlined_call_operand.vmem [shape: f32[32,1], index: 2, kind: input, shape index: {}]   ;;  %s999_s3 = inlined_call_operand.vmem [shape: f32[32,1], index: 3, kind: input, shape index: {}]   ;;  %s1000_s4 = inlined_call_operand.hbm [shape: f32[2,32,256], index: 4, kind: output, shape index: {}]  }
   0x1   :  { %11 = vsyncpa [#allocation3 + $0x1], 0 }
   0x2   :  { %12 = vsyncpa [#allocation4], 0 }
   0x3   :  { %14 = vsyncpa [#allocation4 + $0x1], 0  ;;  %s791_s15 = smov 0   ;;  %s793_s16 = smov 0  }
   0x4   :  { %s795_s17 = smov 0   ;;  %s797_s18 = smov 0  }
   0x5   :  { %s799_s19 = smov 0   ;;  %s801_s20 = smov 0  }
   0x6 LB: > { %s541_s21 = sadd.s32 4294967295, %s756_s20   ;;  %s542_s22 = sadd.s32 4294967294, %s756_s20   ;;  %s756_s20 = sphi %s801_s20, %s20_s20   ;;  %s752_s19 = sphi %s799_s19, %s1011_s19   ;;  %s748_s18 = sphi %s797_s18, %s1010_s18   ;;  %s744_s17 = sphi %s795_s17, %s1009_s17   ;;  %s740_s16 = sphi %s793_s16, %s1008_s16   ;;  %s736_s15 = sphi %s791_s15, %s1007_s15  }
   0x7   : > { %s32_s23 = sadd.s32 1, %s752_s19  ;;  %s41_s24 = sadd.s32 1, %s744_s17 }
   0x8   : > { %p34_p0 = scmp.ge.s32.totalorder %s32_s23, 2  ;;  %p48_p1 = scmp.ne.s32.totalorder %s744_s17, %s740_s16 }
   0x9   : > { %p49_p2 = scmp.eq.s32.totalorder %s756_s20, 0  ;;  %p54_p3 = scmp.ne.s32.totalorder %s740_s16, %s736_s15 }
   0xa   : > { %s1013_s23 = smov (%p34_p0, %s32_s23), 0  ;;  %p55_p5 = scmp.eq.s32.totalorder %s541_s21, 0 }
   0xb   : > { %p832_p4 = por %p49_p2, %p48_p1  ;;  %s36_s26 = ssub.s32 %s752_s19, %s1013_s23 }
   0xc   : > { %p143_p6 = scmp.eq.s32.totalorder %s541_s21, 1  ;;  %p39_p7 = scmp.eq.s32.totalorder %s36_s26, 0 }
   0xd   : > { %p838_p8 = por %p55_p5, %p54_p3  ;;  %p149_p10 = scmp.eq.s32.totalorder %s542_s22, 1 }
   0xe   : > { %p842_p9 = por %p143_p6, %p48_p1  ;;  %p590_p13 = scmp.lt.s32.totalorder %s756_s20, 2 }
   0xf   : > { %s847_s29 = scalar_select %p39_p7, %s744_s17, %s41_s24  }
  0x10   : > { %p849_p11 = por %p149_p10, %p54_p3  ;;  %s178_s5 = sand.u32 1, %s744_s17  }
  0x11   : > { %s545_s6 = sshll.u32 %s178_s5, 7  ;;  %s560_s7 = sshll.u32 %s752_s19, 11 }
  0x12   : > { %s190_s10 = scalar_lea.hbm %s996_s0, %s560_s7  ;;  %s182_s11 = scalar_lea.vmem [#allocation2], %s545_s6 }
  0x13   : > { %s191_s12 = sshll.u32 %s182_s11, 4  ;;  %p862_p0 = pnand %p590_p13, %p832_p4  ;;  %s192_s12 = int_to_ptr.vmem [resolvable:$true] %s191_s12 }
  0x14   : > { %p548_p1 = scmp.ge.s32.totalorder %s756_s20, 1  ;;  %s179_s14 = scalar_lea.sflag [#allocation3], %s178_s5 }
  0x15   : > { %p650_p2 = pneg %p862_p0  ;;  %s661_s21 = scalar_lea.vmem %s192_s12, 2048 }
  0x16   : > { %p662_p3 = scmp.ne.s32.totalorder %s192_s12, %s661_s21  ;;  %s758_s22 = smov [#allocation2]  }
  0x17   : > { %s666_s24 = sshll.u32 %s758_s22, 4  ;;  %s667_s24 = int_to_ptr.vmem [resolvable:$false] %s666_s24 }
  0x18   : > { %p664_p5 = pnand %p662_p3, %p650_p2  ;;  %s668_s26 = scalar_lea.vmem %s667_s24, 4096 }
  0x19   : > { %p669_p7 = scmp.lt.s32.totalorder %s192_s12, %s667_s24  ;;  %p670_p10 = scmp.lt.s32.totalorder %s668_s26, %s661_s21 }
  0x1a   : > { %p665_p6 = pneg %p664_p5 }
  0x1b   : > { %p671_p12 = por %p670_p10, %p669_p7 }
  0x1d   : > { %p672_p4 = pnand %p671_p12, %p665_p6 }
  0x1f   : > { %675 = shalt.err (!%p672_p4)
}
  0x20   : > { %s759_s25 = smov 256   ;;  %s760_s5 = smov 16  }
  0x21   : > { %585 = dma.hbm_to_vmem [thread:$0]  (!%p862_p0), %s190_s10, 2048, %s192_s12, %s179_s14, %s759_s25, %s759_s25, %s760_s5  }
  0x22   : > { %p199_p13 = scmp.lt.s32.totalorder %s756_s20, 3 }
  0x24   : > { %p200_p2 = pnand %p548_p1, %p199_p13 }
  0x25   : > { %s875_s6 = sand.u32 (!%p200_p2), 1, %s740_s16  }
  0x26   : > { %203 = sbr.rel (%p200_p2) target bundleno = 282 (0x11a), region = 36  ;;  %s549_s7 = sshll.u32 (!%p200_p2), %s875_s6, 7 }
  0x27   : > { %s206_s8 = scalar_lea.sflag (!%p200_p2), [#allocation3], %s875_s6  ;;  %s879_s9 = scalar_lea.vmem (!%p200_p2), [#allocation2], %s549_s7 }
  0x2b   : > { %727 = dma.done.wait (%p838_p8), %s206_s8, 2048  }
  0x2c   : > { %729 = vsyncadd (%p838_p8), %s206_s8, 4294965248  ;;  %v761_v0 = vmov 0.0   ;;  %v762_v1 = vmov 0   ;;  %v255_v2 = vld [vmem:[%s879_s9 + $0x78] sm:$0xff]  ;;  %v254_v3 = vld [vmem:[%s879_s9 + $0x70] sm:$0xff]  ;;  %vm256_vm0 = vcmask 523264  }
  0x2d   : > { %333 = vmatprep.mubr.f32.mxu0 %v761_v0  ;;  %345 = vmatprep.mubr.f32.mxu1 %v761_v0  ;;  %v253_v4 = vld [vmem:[%s879_s9 + $0x68] sm:$0xff]  ;;  %v252_v5 = vld [vmem:[%s879_s9 + $0x60] sm:$0xff]  ;;  %v251_v6 = vld [vmem:[%s879_s9 + $0x58] sm:$0xff]  ;;  %s550_s26 = sshll.u32 %s875_s6, 6  ;;  %s561_s7 = sshll.u32 %s748_s18, 10 }
  0x2e   : > { %647 = vset.pattern.permute.xlu1 %v762_v1  ;;  %646 = vset.pattern.permute.xlu0 %v762_v1  ;;  %v250_v7 = vld [vmem:[%s879_s9 + $0x50] sm:$0xff]  ;;  %v249_v8 = vld [vmem:[%s879_s9 + $0x48] sm:$0xff]  ;;  %v248_v9 = vld [vmem:[%s879_s9 + $0x40] sm:$0xff]  ;;  %s233_s25 = scalar_lea.vmem [#allocation5], %s550_s26  ;;  %s948_s27 = scalar_lea.hbm %s1000_s4, %s561_s7 }
  0x2f   : > { %285 = vmatprep.subr.mxu0 %v255_v2  ;;  %562 = vmatprep.subr.mxu1 %v255_v2  ;;  %v247_v10 = vld [vmem:[%s879_s9 + $0x38] sm:$0xff]  ;;  %v246_v11 = vld [vmem:[%s879_s9 + $0x30] sm:$0xff]  ;;  %v245_v12 = vld [vmem:[%s879_s9 + $0x28] sm:$0xff]  ;;  %s454_s5 = sshll.u32 %s233_s25, 4  ;;  %s439_s18 = scalar_lea.sflag [#allocation4], %s875_s6  ;;  %s943_s5 = int_to_ptr.vmem [resolvable:$true] %s454_s5 }
  0x30   : > { %286 = vmatpush1.msra.mxu0 %v254_v3  ;;  %570 = vmatpush1.msra.mxu1 %v254_v3  ;;  %v244_v13 = vld [vmem:[%s879_s9 + $0x20] sm:$0xff]  ;;  %v243_v14 = vld [vmem:[%s879_s9 + $0x18] sm:$0xff]  ;;  %v242_v15 = vld [vmem:[%s879_s9 + $0x10] sm:$0xff]  ;;  %s676_s10 = scalar_lea.vmem %s943_s5, 1024  ;;  %s763_s11 = smov [#allocation5]  }
  0x31   : > { %287 = vmatprep.subr.mxu0 %v253_v4  ;;  %563 = vmatprep.subr.mxu1 %v253_v4  ;;  %v241_v16 = vld [vmem:[%s879_s9 + $0x8] sm:$0xff]  ;;  %v240_v17 = vld [vmem:[%s879_s9] sm:$0xff]  ;;  %v238_v19 = vld [vmem:[%s997_s1 + $0x10] sm:$0xff]  ;;  %p677_p8 = scmp.ne.s32.totalorder %s943_s5, %s676_s10  ;;  %s680_s12 = sshll.u32 %s763_s11, 4  ;;  %s681_s12 = int_to_ptr.vmem [resolvable:$false] %s680_s12 }
  0x32   : > { %288 = vmatpush1.msra.mxu0 %v252_v5  ;;  %571 = vmatpush1.msra.mxu1 %v252_v5  ;;  %v236_v18 = vld [vmem:[%s997_s1] sm:$0xff]  ;;  %v360_v20 = vld [vmem:[%s998_s2 + $0x10] sm:$0xff]  ;;  %v237_v22 = vld [vmem:[%s997_s1 + $0x8] sm:$0xff]  ;;  %s682_s13 = scalar_lea.vmem %s681_s12, 2048  ;;  %p683_p1 = scmp.lt.s32.totalorder %s943_s5, %s681_s12 }
  0x33   : > { %289 = vmatprep.subr.mxu0 %v251_v6  ;;  %564 = vmatprep.subr.mxu1 %v251_v6  ;;  %v358_v21 = vld [vmem:[%s998_s2] sm:$0xff]  ;;  %v239_v23 = vld [vmem:[%s997_s1 + $0x18] sm:$0xff]  ;;  %v359_v25 = vld [vmem:[%s998_s2 + $0x8] sm:$0xff]  ;;  %p678_p12 = pnand %p677_p8, %p842_p9  ;;  %p684_p3 = scmp.lt.s32.totalorder %s682_s13, %s676_s10 }
  0x34   : > { %290 = vmatpush1.msra.mxu0 %v250_v7  ;;  %572 = vmatpush1.msra.mxu1 %v250_v7  ;;  %v361_v24 = vld [vmem:[%s998_s2 + $0x18] sm:$0xff]  ;;  %v391_v26 = vld [vmem:[%s999_s3 + $0x8] sm:$0xff]  ;;  %v390_v27 = vld [vmem:[%s999_s3] sm:$0xff] }
  0x35   : > { %291 = vmatprep.subr.mxu0 %v249_v8  ;;  %565 = vmatprep.subr.mxu1 %v249_v8  ;;  %v393_v28 = vld [vmem:[%s999_s3 + $0x18] sm:$0xff]  ;;  %v392_v29 = vld [vmem:[%s999_s3 + $0x10] sm:$0xff]  ;;  %p679_p0 = pneg %p678_p12  ;;  %p685_p5 = por %p684_p3, %p683_p1 }
  0x36   : > { %292 = vmatpush1.msra.mxu0 %v248_v9  ;;  %573 = vmatpush1.msra.mxu1 %v248_v9 }
  0x37   : > { %293 = vmatprep.subr.mxu0 %v247_v10  ;;  %566 = vmatprep.subr.mxu1 %v247_v10  ;;  %p686_p6 = pnand %p685_p5, %p679_p0 }
  0x38   : > { %294 = vmatpush1.msra.mxu0 %v246_v11  ;;  %574 = vmatpush1.msra.mxu1 %v246_v11 }
  0x39   : > { %295 = vmatprep.subr.mxu0 %v245_v12  ;;  %567 = vmatprep.subr.mxu1 %v245_v12 }
  0x3a   : > { %296 = vmatpush1.msra.mxu0 %v244_v13  ;;  %575 = vmatpush1.msra.mxu1 %v244_v13 }
  0x3b   : > { %297 = vmatprep.subr.mxu0 %v243_v14  ;;  %568 = vmatprep.subr.mxu1 %v243_v14 }
  0x3c   : > { %298 = vmatpush1.msra.mxu0 %v242_v15  ;;  %576 = vmatpush1.msra.mxu1 %v242_v15 }
  0x3d   : > { %299 = vmatprep.subr.mxu0 %v241_v16  ;;  %569 = vmatprep.subr.mxu1 %v241_v16 }
  0x3e   : > { %300 = vmatpush1.msra.mxu0 %v240_v17  ;;  %577 = vmatpush1.msra.mxu1 %v240_v17 }
  0x3f   : > { %551 = vmatmul.mubr.msk.f32.vlgmr.msra.gmra.mxu0 %vm256_vm0, %v236_v18  ;;  %553 = vmatmul.mubr.msk.f32.vlgmr.msra.gmra.mxu1 %vm256_vm0, %v238_v19 }
  0x40   : > { %339 = vmatprep.mubr.f32.mxu0 %v761_v0  ;;  %351 = vmatprep.mubr.f32.mxu1 %v761_v0 }
  0x41   : > { %374 = vperm.xlu1 %647, %v360_v20   ;;  %364 = vperm.xlu0 %646, %v358_v21  }
  0x43   : > { %552 = vmatmul.mubr.msk.f32.gmra.mxu0 %vm256_vm0, %v237_v22  ;;  %554 = vmatmul.mubr.msk.f32.gmra.mxu1 %vm256_vm0, %v239_v23 }
  0x45   : > { %379 = vperm.xlu1 %647, %v361_v24   ;;  %369 = vperm.xlu0 %646, %v359_v25  }
  0x49   : > { %401 = vperm.xlu1 %647, %v391_v26   ;;  %396 = vperm.xlu0 %646, %v390_v27  }
  0x4d   : > { %411 = vperm.xlu1 %647, %v393_v28   ;;  %406 = vperm.xlu0 %646, %v392_v29  }
  0xbc   : > { %v365_v30 = vpop.permute.xlu0 %364  ;;  %v375_v31 = vpop.permute.xlu1 %374 }
  0xc0   : > { %v370_v32 = vpop.permute.xlu0 %369  ;;  %v380_v33 = vpop.permute.xlu1 %379 }
  0xc4   : > { %v397_v34 = vpop.permute.xlu0 %396  ;;  %v402_v37 = vpop.permute.xlu1 %401 }
  0xc8   : > { %v407_v38 = vpop.permute.xlu0 %406  ;;  %v412_v57 = vpop.permute.xlu1 %411 }
  0xff   : > { %v335_v35 = vpop.f32.mrf.mxu0  ;;  %v347_v36 = vpop.f32.mrf.mxu1 }
 0x100   : > { %v382_v39 = vmul.f32 %v365_v30, %v335_v35  ;;  %v386_v40 = vmul.f32 %v375_v31, %v347_v36 }
 0x101   : > { %v337_v41 = vpop.f32.mrf.mxu0  ;;  %v349_v42 = vpop.f32.mrf.mxu1 }
 0x102   : > { %v414_v43 = vadd.f32 %v397_v34, %v382_v39  ;;  %v418_v44 = vadd.f32 %v407_v38, %v386_v40  ;;  %v383_v45 = vmul.f32 %v365_v30, %v337_v41  ;;  %v387_v46 = vmul.f32 %v375_v31, %v349_v42 }
 0x103   : > { %v341_v47 = vpop.f32.mrf.mxu0  ;;  %v353_v48 = vpop.f32.mrf.mxu1 }
 0x104   : > { %v422_v49 = vmax.f32 %v414_v43, 0.0  ;;  %v426_v50 = vmax.f32 %v418_v44, 0.0  ;;  %v415_v51 = vadd.f32 %v397_v34, %v383_v45  ;;  %v419_v52 = vadd.f32 %v407_v38, %v387_v46 }
 0x105   : > { %v384_v53 = vmul.f32 %v370_v32, %v341_v47  ;;  %v388_v54 = vmul.f32 %v380_v33, %v353_v48  ;;  %v343_v55 = vpop.f32.mrf.mxu0  ;;  %v355_v56 = vpop.f32.mrf.mxu1 }
 0x106   : > { %430 = vst [vmem:[%s233_s25] sm:$0xff] %v422_v49  ;;  %434 = vst [vmem:[%s233_s25 + $0x20] sm:$0xff] %v426_v50  ;;  %v423_v58 = vmax.f32 %v415_v51, 0.0  ;;  %v427_v59 = vmax.f32 %v419_v52, 0.0  ;;  %v385_v60 = vmul.f32 %v370_v32, %v343_v55  ;;  %v389_v61 = vmul.f32 %v380_v33, %v355_v56 }
 0x107   : > { %v416_v62 = vadd.f32 %v402_v37, %v384_v53  ;;  %v420_v63 = vadd.f32 %v412_v57, %v388_v54 }
 0x108   : > { %431 = vst [vmem:[%s233_s25 + $0x8] sm:$0xff] %v423_v58  ;;  %435 = vst [vmem:[%s233_s25 + $0x28] sm:$0xff] %v427_v59  ;;  %v417_v0 = vadd.f32 %v402_v37, %v385_v60  ;;  %v421_v1 = vadd.f32 %v412_v57, %v389_v61 }
 0x109   : > { %v424_v2 = vmax.f32 %v416_v62, 0.0  ;;  %v428_v3 = vmax.f32 %v420_v63, 0.0 }
 0x10a   : > { %v425_v4 = vmax.f32 %v417_v0, 0.0  ;;  %v429_v5 = vmax.f32 %v421_v1, 0.0 }
 0x10b   : > { %432 = vst [vmem:[%s233_s25 + $0x10] sm:$0xff] %v424_v2  ;;  %436 = vst [vmem:[%s233_s25 + $0x30] sm:$0xff] %v428_v3 }
 0x10c   : > { %433 = vst [vmem:[%s233_s25 + $0x18] sm:$0xff] %v425_v4  ;;  %437 = vst [vmem:[%s233_s25 + $0x38] sm:$0xff] %v429_v5 }
 0x10d   : > { %689 = shalt.err (!%p686_p6)
}
 0x10e   : > { %s690_s14 = scalar_lea.hbm %s948_s27, 1024  ;;  %s694_s24 = scalar_lea.hbm %s1000_s4, 2048 }
 0x10f   : > { %p691_p7 = scmp.ne.s32.totalorder %s948_s27, %s690_s14  ;;  %p695_p13 = scmp.lt.s32.totalorder %s948_s27, %s1000_s4 }
 0x110   : > { %p696_p2 = scmp.lt.s32.totalorder %s694_s24, %s690_s14 }
 0x111   : > { %p692_p10 = pnand %p691_p7, %p842_p9 }
 0x112   : > { %p697_p8 = por %p696_p2, %p695_p13 }
 0x113   : > { %p693_p4 = pneg %p692_p10 }
 0x115   : > { %p698_p12 = pnand %p697_p8, %p693_p4 }
 0x117   : > { %701 = shalt.err (!%p698_p12)
}
 0x118   : > { %s764_s7 = smov 256   ;;  %s765_s8 = smov 16  }
 0x119   : > { %580 = dma.vmem_to_hbm [thread:$0]  (%p842_p9), %s943_s5, 1024, %s948_s27, %s439_s18, %s764_s7, %s764_s7, %s765_s8  }
 0x11a PF: > { %s469_s9 = sand.u32 1, %s736_s15   ;;  %p1006_p0 = scmp.ge.s32.totalorder %s756_s20, 2 }
 0x11b   : > { %s470_s10 = scalar_lea.sflag [#allocation4], %s469_s9 }
 0x11c   : > { %p587_p1 = pnand %p1006_p0, %p849_p11 }
 0x11e   : > { %p588_p3 = pneg %p587_p1 }
 0x120   : > { %731 = dma.done.wait (%p588_p3), %s470_s10, 1024  }
 0x121   : > { %733 = vsyncadd (%p588_p3), %s470_s10, 4294966272  ;;  %s20_s20 = sadd.s32 1, %s756_s20   ;;  %s1007_s15 = smov %s740_s16 }
 0x122   : > { %p17_p5 = scmp.ge.s32.totalorder %s20_s20, 4   ;;  %s1008_s16 = smov %s744_s17 }
 0x123   : > { %s1009_s17 = smov %s847_s29  ;;  %s1010_s18 = smov %s752_s19 }
 0x124   : > { %s1011_s19 = smov %s1013_s23  ;;  %19 = sbr.rel (!%p17_p5) target bundleno = 6 (0x6), region = 81 }
 0x129   :  { %475 = vsyncpa [#allocation3], 1 }
 0x12a   :  { %477 = vsyncpa [#allocation3 + $0x1], 1 }
 0x12b   :  { %478 = vsyncpa [#allocation4], 1 }
 0x12c   :  { %480 = vsyncpa [#allocation4 + $0x1], 1 }

</bundles_post_ra>
